<compile_context>
chip_gen: v6e
topology: v6e:2x2x1
jax: 0.10.0
libtpu: 0.0.40
codegen_flags: <defaults>
</compile_context>

<pallas_src>
import functools
import math

import jax
import jax.numpy as jnp
from jax.experimental import pallas as pl
from jax.experimental.pallas import tpu as pltpu


def _round_up(x, m):
    return (x + m - 1) // m * m


def _gin_layer_kernel(cols_ref, counts_ref, a_ref, x_ref, w_ref, b_ref,
                      o_ref, acc_ref, *, activation, valid_out, x_resident, tk):
    """One GIN layer for a row block; grid axis 1 walks nonzero column blocks."""
    i = pl.program_id(0)
    k = pl.program_id(1)

    @pl.when(k == 0)
    def _():
        acc_ref[...] = jnp.zeros_like(acc_ref)

    # Only accumulate for genuinely nonzero adjacency blocks; padded grid steps
    # repeat the previous block index (no DMA) and are skipped here (no MXU).
    @pl.when(k < counts_ref[i])
    def _():
        # int8 edge counts -> bf16 MXU input (VPU cast is free filler when
        # memory bound); f32 accumulation.
        a_tile = a_ref[...].astype(jnp.float32).astype(jnp.bfloat16)
        if x_resident:
            start = pl.multiple_of(cols_ref[i, k] * tk, tk)
            x_tile = x_ref[pl.ds(start, tk), :]
        else:
            x_tile = x_ref[...]
        acc_ref[...] += jnp.dot(a_tile, x_tile,
                                preferred_element_type=jnp.float32)

    @pl.when(k == pl.num_programs(1) - 1)
    def _():
        # epilogue matmul in bf16 (f32 accumulate), bias add in f32
        h = jnp.dot(acc_ref[...].astype(jnp.bfloat16), w_ref[...],
                    preferred_element_type=jnp.float32) + b_ref[...]
        if activation == "relu":
            o_ref[...] = jnp.maximum(h, 0.0).astype(o_ref.dtype)
        else:
            # log_softmax over the valid (unpadded) class columns only
            col = jax.lax.broadcasted_iota(jnp.int32, h.shape, 1)
            valid = col < valid_out
            hm = jnp.where(valid, h, -1e30)
            m = jnp.max(hm, axis=-1, keepdims=True)
            e = jnp.where(valid, jnp.exp(hm - m), 0.0)
            lse = m + jnp.log(jnp.sum(e, axis=-1, keepdims=True))
            o_ref[...] = jnp.where(valid, h - lse, 0.0).astype(o_ref.dtype)


def _vmem_cap_bytes():
    """Physical VMEM of this generation (fallback 64 MiB = v7x)."""
    phys = 64 << 20
    try:
        cap = getattr(pltpu.get_tpu_info(), "vmem_capacity_bytes", None)
        if cap:
            phys = int(cap)
    except Exception:
        pass
    return phys


def _gin_layer(a_i8, cols, counts, x_bf16, w_bf16, b_f32, *, tm, tk,
               activation, valid_out):
    n_p = a_i8.shape[0]
    d_in = x_bf16.shape[1]
    d_out = w_bf16.shape[1]
    nrb, ncb = n_p // tm, n_p // tk

    # keep x resident in VMEM when it is small enough (safe on v7x's 64 MiB)
    x_bytes = n_p * d_in * 2
    x_resident = x_bytes <= (8 << 20)

    out_dtype = jnp.float32 if activation == "log_softmax" else jnp.bfloat16
    out_elt = 4 if out_dtype == jnp.float32 else 2

    # cost estimate: A' once (int8), x once if resident else once per row block
    flops = 2 * n_p * n_p * d_in + 2 * n_p * d_in * d_out
    x_reads = 1 if x_resident else nrb
    cost = pl.CostEstimate(
        flops=flops,
        transcendentals=n_p * d_out if activation == "log_softmax" else 0,
        bytes_accessed=(a_i8.size
                        + x_bytes * x_reads
                        + w_bf16.size * 2 + b_f32.size * 4
                        + n_p * d_out * out_elt
                        + cols.size * 4 + counts.size * 4),
    )

    # VMEM estimate: double-buffered inputs/outputs + resident f32 accumulator,
    # capped below physical VMEM of this generation (headroom for compiler
    # internal scratch).
    a_tile = tm * tk * 1
    x_block = x_bytes if x_resident else tk * d_in * 2
    est = (2 * (a_tile + x_block + d_in * d_out * 2 + d_out * 4
                + tm * d_out * out_elt)
           + tm * d_in * 4 + (4 << 20))
    vmem_limit = min(max(est, 32 << 20), _vmem_cap_bytes() - (8 << 20))

    kernel = functools.partial(_gin_layer_kernel, activation=activation,
                               valid_out=valid_out, x_resident=x_resident,
                               tk=tk)

    if x_resident:
        x_spec = pl.BlockSpec((n_p, d_in), lambda i, k, c, cnt: (0, 0))
    else:
        x_spec = pl.BlockSpec((tk, d_in), lambda i, k, c, cnt: (c[i, k], 0))

    return pl.pallas_call(
        kernel,
        out_shape=jax.ShapeDtypeStruct((n_p, d_out), out_dtype),
        grid_spec=pltpu.PrefetchScalarGridSpec(
            num_scalar_prefetch=2,            # cols (nrb, ncb), counts (nrb,)
            grid=(nrb, ncb),
            in_specs=[
                pl.BlockSpec((tm, tk), lambda i, k, c, cnt: (i, c[i, k])),  # A'
                x_spec,                                                      # x
                pl.BlockSpec((d_in, d_out), lambda i, k, c, cnt: (0, 0)),    # W
                pl.BlockSpec((1, d_out), lambda i, k, c, cnt: (0, 0)),       # b
            ],
            out_specs=pl.BlockSpec((tm, d_out), lambda i, k, c, cnt: (i, 0)),
            scratch_shapes=[pltpu.VMEM((tm, d_in), jnp.float32)],
        ),
        compiler_params=pltpu.CompilerParams(
            dimension_semantics=("parallel", "arbitrary"),
            vmem_limit_bytes=vmem_limit),
        cost_estimate=cost,
    )(cols, counts, a_i8, x_bf16, w_bf16, b_f32)


def gin_model_forward(x, edge_index, params):
    """GINModel.forward: GINConv layers (ReLU between), final log_softmax."""
    n, d_in = x.shape
    src = edge_index[0].astype(jnp.int32)
    tgt = edge_index[1].astype(jnp.int32)

    # A'[i, j] = (# edges j -> i) + [i == j]   (eps = 0)
    # TODO(synk): scatter-add (edge_index -> dense A') has no Pallas TPU
    # equivalent, so this glue stays in plain JAX.
    a = jnp.zeros((n, n), jnp.int32).at[tgt, src].add(1)
    a = a + jnp.eye(n, dtype=jnp.int32)
    a = jnp.minimum(a, 127)   # int8 storage; saturate >127 parallel edges

    # pad node count to a multiple of 256 so tk never collapses to 128 and
    # there are always >= 2 row blocks (megacore), feature dims to 128 lanes
    n_p = _round_up(max(n, 1), 256)
    tk = 512 if n_p % 512 == 0 else 256
    tm = min(256, n_p // 2)
    nrb, ncb = n_p // tm, n_p // tk

    a_p = jnp.zeros((n_p, n_p), jnp.int8).at[:n, :n].set(a.astype(jnp.int8))

    # block-sparsity metadata (shared by all layers): per row block, the
    # ascending list of nonzero column blocks, padded by repeating the last
    # valid entry so padded grid steps trigger no new DMA.
    blk = a_p.reshape(nrb, tm, ncb, tk)
    nnz = jnp.any(blk != 0, axis=(1, 3))
    counts = jnp.sum(nnz, axis=1).astype(jnp.int32)
    order = jnp.argsort((~nnz).astype(jnp.int32), axis=1,
                        stable=True).astype(jnp.int32)
    pad_idx = jnp.minimum(jnp.arange(ncb, dtype=jnp.int32)[None, :],
                          jnp.maximum(counts - 1, 0)[:, None])
    cols = jnp.take_along_axis(order, pad_idx, axis=1).astype(jnp.int32)

    dims = [d_in] + [w.shape[1] for w, _ in params]
    dims_p = [_round_up(d, 128) for d in dims]

    h = jnp.zeros((n_p, dims_p[0]), jnp.bfloat16).at[:n, :d_in].set(
        x.astype(jnp.bfloat16))

    n_layers = len(params)
    for li, (w, b) in enumerate(params):
        fin, fout = w.shape
        w_p = jnp.zeros((dims_p[li], dims_p[li + 1]),
                        jnp.bfloat16).at[:fin, :fout].set(w.astype(jnp.bfloat16))
        b_p = jnp.zeros((1, dims_p[li + 1]), jnp.float32).at[0, :fout].set(b)
        last = li == n_layers - 1
        h = _gin_layer(a_p, cols, counts, h, w_p, b_p, tm=tm, tk=tk,
                       activation="log_softmax" if last else "relu",
                       valid_out=fout)
    return h[:n, :params[-1][0].shape[1]]


def init_params(key, in_channels, hidden_channels, out_channels, num_layers=2):
    dims = ([in_channels] + [hidden_channels] * (num_layers - 1)
            + [out_channels])
    keys = jax.random.split(key, 2 * num_layers)
    params = []
    for i in range(num_layers):
        fin, fout = dims[i], dims[i + 1]
        bound = 1.0 / math.sqrt(fin)
        w = jax.random.uniform(keys[2 * i], (fin, fout), jnp.float32,
                               -bound, bound)
        b = jax.random.uniform(keys[2 * i + 1], (fout,), jnp.float32,
                               -bound, bound)
        params.append((w, b))
    return params


def ref_forward(x, edge_index, params):
    """Plain-JAX reference mirroring the kernel's bf16 rounding points."""
    n = x.shape[0]
    a = jnp.zeros((n, n), jnp.float32).at[edge_index[1], edge_index[0]].add(1.0)
    a = a + jnp.eye(n, dtype=jnp.float32)        # small ints: exact in bf16
    h = x.astype(jnp.bfloat16).astype(jnp.float32)
    for li, (w, b) in enumerate(params):
        agg = jnp.dot(a, h)
        w_q = w.astype(jnp.bfloat16).astype(jnp.float32)
        h = jnp.dot(agg.astype(jnp.bfloat16).astype(jnp.float32), w_q) + b
        if li < len(params) - 1:
            h = jnp.maximum(h, 0.0).astype(jnp.bfloat16).astype(jnp.float32)
    return jax.nn.log_softmax(h, axis=1)


if __name__ == "__main__":
    N, IN_C, HID_C, OUT_C = 16, 16, 32, 8        # nodes, in/hidden/out channels
    key = jax.random.PRNGKey(0)
    k_x, k_p = jax.random.split(key)

    x = jax.random.normal(k_x, (N, IN_C), jnp.float32)

    # deterministic simple graph: bidirectional ring + one-directional chords
    idx = jnp.arange(N)
    src = jnp.concatenate([idx, (idx + 1) % N, idx])
    tgt = jnp.concatenate([(idx + 1) % N, idx, (idx + 3) % N])
    edge_index = jnp.stack([src, tgt]).astype(jnp.int32)   # [2, 48]

    params = init_params(k_p, IN_C, HID_C, OUT_C, num_layers=2)

    out = gin_model_forward(x, edge_index, params)
    out = jax.block_until_ready(out)
    ref = ref_forward(x, edge_index, params)

    assert out.shape == (N, OUT_C)
    assert bool(jnp.all(jnp.isfinite(out)))
    # log_softmax rows must exponentiate-sum to 1
    assert bool(jnp.allclose(jnp.sum(jnp.exp(out), axis=1), 1.0, atol=1e-3))
    assert bool(jnp.allclose(out, ref, atol=5e-2, rtol=5e-2)), \
        float(jnp.max(jnp.abs(out - ref)))
    print("KERNEL_OK")
</pallas_src>

<mosaic_0001>
module attributes {stable_mosaic.version = 11 : i64} {
  func.func @_gin_layer_kernel(%arg0: i32, %arg1: i32, %arg2: memref<2x1xi32, #tpu.memory_space<smem>>, %arg3: memref<2xi32, #tpu.memory_space<smem>>, %arg4: memref<128x256xi8, #tpu.memory_space<vmem>>, %arg5: memref<256x128xbf16, #tpu.memory_space<vmem>>, %arg6: memref<128x128xbf16, #tpu.memory_space<vmem>>, %arg7: memref<1x128xf32, #tpu.memory_space<vmem>>, %arg8: memref<128x128xbf16, #tpu.memory_space<vmem>>, %arg9: memref<128x128xf32, #tpu.memory_space<vmem>>) attributes {dimension_semantics = [#tpu.dimension_semantics<parallel>, #tpu.dimension_semantics<arbitrary>], iteration_bounds = array<i64: 2, 1>, scalar_prefetch = 2 : i64, scratch_operands = 1 : i64, tpu.core_type = #tpu.core_type<tc>, window_params = [{transform_indices = @transform_0, window_bounds = array<i64: 128, 256>}, {pipeline_mode = #tpu.pipeline_mode<synchronous>, transform_indices = @transform_1, window_bounds = array<i64: 256, 128>}, {pipeline_mode = #tpu.pipeline_mode<synchronous>, transform_indices = @transform_2, window_bounds = array<i64: 128, 128>}, {pipeline_mode = #tpu.pipeline_mode<synchronous>, transform_indices = @transform_3, window_bounds = array<i64: 1, 128>}, {transform_indices = @transform_4, window_bounds = array<i64: 128, 128>}]} {
    %c0_i32 = arith.constant 0 : i32
    %0 = arith.cmpi eq, %arg1, %c0_i32 : i32
    %1 = arith.extui %0 : i1 to i32
    %c0_i32_0 = arith.constant 0 : i32
    %2 = arith.cmpi ne, %1, %c0_i32_0 : i32
    scf.if %2 {
      %cst = arith.constant 0.000000e+00 : f32
      %11 = vector.broadcast %cst : f32 to vector<128x128xf32>
      %c0 = arith.constant 0 : index
      %c0_4 = arith.constant 0 : index
      %12 = vector.load %arg9[%c0, %c0_4] : memref<128x128xf32, #tpu.memory_space<vmem>>, vector<128x128xf32>
      tpu.vector_store %arg9[%c0, %c0_4], %11 {strides = array<i32>} : memref<128x128xf32, #tpu.memory_space<vmem>>, vector<128x128xf32>,
    } else {
    }
    %3 = arith.index_cast %arg0 : i32 to index
    %4 = memref.load %arg3[%3] : memref<2xi32, #tpu.memory_space<smem>>
    %5 = arith.cmpi slt, %arg1, %4 : i32
    %6 = arith.extui %5 : i1 to i32
    %c0_i32_1 = arith.constant 0 : i32
    %7 = arith.cmpi ne, %6, %c0_i32_1 : i32
    scf.if %7 {
      %c0 = arith.constant 0 : index
      %c0_4 = arith.constant 0 : index
      %11 = vector.load %arg4[%c0, %c0_4] : memref<128x256xi8, #tpu.memory_space<vmem>>, vector<128x256xi8>
      %12 = arith.sitofp %11 : vector<128x256xi8> to vector<128x256xf32>
      %13 = arith.truncf %12 : vector<128x256xf32> to vector<128x256xbf16>
      %14 = arith.index_cast %arg0 : i32 to index
      %15 = arith.index_cast %arg1 : i32 to index
      %16 = memref.load %arg2[%14, %15] : memref<2x1xi32, #tpu.memory_space<smem>>
      %c256_i32 = arith.constant 256 : i32
      %17 = arith.muli %16, %c256_i32 : i32
      %18 = tpu.assume_multiple %17, 256 : i32
      %19 = arith.index_cast %18 : i32 to index
      %c0_5 = arith.constant 0 : index
      %20 = vector.load %arg5[%19, %c0_5] : memref<256x128xbf16, #tpu.memory_space<vmem>>, vector<256x128xbf16>
      %c0_6 = arith.constant 0 : index
      %c0_7 = arith.constant 0 : index
      %21 = vector.load %arg9[%c0_6, %c0_7] : memref<128x128xf32, #tpu.memory_space<vmem>>, vector<128x128xf32>
      %cst = arith.constant dense<0.000000e+00> : vector<128x128xf32>
      %22 = tpu.matmul %13, %20, %cst {dimension_numbers = #tpu.dot_dimension_numbers<[1], [0], [0], [1], [0, 0, 1, 1], [], []>} : vector<128x256xbf16>, vector<256x128xbf16>, vector<128x128xf32> -> vector<128x128xf32>
      %23 = arith.addf %21, %22 : vector<128x128xf32>
      %c0_8 = arith.constant 0 : index
      %c0_9 = arith.constant 0 : index
      %24 = vector.load %arg9[%c0_8, %c0_9] : memref<128x128xf32, #tpu.memory_space<vmem>>, vector<128x128xf32>
      tpu.vector_store %arg9[%c0_8, %c0_9], %23 {strides = array<i32>} : memref<128x128xf32, #tpu.memory_space<vmem>>, vector<128x128xf32>,
    } else {
    }
    %c0_i32_2 = arith.constant 0 : i32
    %8 = arith.cmpi eq, %arg1, %c0_i32_2 : i32
    %9 = arith.extui %8 : i1 to i32
    %c0_i32_3 = arith.constant 0 : i32
    %10 = arith.cmpi ne, %9, %c0_i32_3 : i32
    scf.if %10 {
      %c0 = arith.constant 0 : index
      %c0_4 = arith.constant 0 : index
      %11 = vector.load %arg9[%c0, %c0_4] : memref<128x128xf32, #tpu.memory_space<vmem>>, vector<128x128xf32>
      %12 = arith.truncf %11 : vector<128x128xf32> to vector<128x128xbf16>
      %c0_5 = arith.constant 0 : index
      %c0_6 = arith.constant 0 : index
      %13 = vector.load %arg6[%c0_5, %c0_6] : memref<128x128xbf16, #tpu.memory_space<vmem>>, vector<128x128xbf16>
      %cst = arith.constant dense<0.000000e+00> : vector<128x128xf32>
      %14 = tpu.matmul %12, %13, %cst {dimension_numbers = #tpu.dot_dimension_numbers<[1], [0], [0], [1], [0, 0, 1, 1], [], []>} : vector<128x128xbf16>, vector<128x128xbf16>, vector<128x128xf32> -> vector<128x128xf32>
      %c0_7 = arith.constant 0 : index
      %c0_8 = arith.constant 0 : index
      %15 = vector.load %arg7[%c0_7, %c0_8] : memref<1x128xf32, #tpu.memory_space<vmem>>, vector<1x128xf32>
      %16 = vector.broadcast %15 : vector<1x128xf32> to vector<128x128xf32>
      %17 = arith.addf %14, %16 : vector<128x128xf32>
      %cst_9 = arith.constant 0.000000e+00 : f32
      %18 = vector.broadcast %cst_9 : f32 to vector<128x128xf32>
      %19 = arith.maximumf %17, %18 : vector<128x128xf32>
      %20 = arith.truncf %19 : vector<128x128xf32> to vector<128x128xbf16>
      %c0_10 = arith.constant 0 : index
      %c0_11 = arith.constant 0 : index
      %21 = vector.load %arg8[%c0_10, %c0_11] : memref<128x128xbf16, #tpu.memory_space<vmem>>, vector<128x128xbf16>
      tpu.vector_store %arg8[%c0_10, %c0_11], %20 {strides = array<i32>} : memref<128x128xbf16, #tpu.memory_space<vmem>>, vector<128x128xbf16>,
    } else {
    }
    return
  }
  func.func @transform_0(%arg0: i32, %arg1: i32, %arg2: memref<2x1xi32, #tpu.memory_space<smem>>, %arg3: memref<2xi32, #tpu.memory_space<smem>>) -> (i32, i32) {
    %0 = arith.index_cast %arg0 : i32 to index
    %1 = arith.index_cast %arg1 : i32 to index
    %2 = memref.load %arg2[%0, %1] : memref<2x1xi32, #tpu.memory_space<smem>>
    %c0_i32 = arith.constant 0 : i32
    return %arg0, %2 : i32, i32
  }
  func.func @transform_1(%arg0: i32, %arg1: i32, %arg2: memref<2x1xi32, #tpu.memory_space<smem>>, %arg3: memref<2xi32, #tpu.memory_space<smem>>) -> (i32, i32) {
    %c0_i32 = arith.constant 0 : i32
    %c0_i32_0 = arith.constant 0 : i32
    %c0_i32_1 = arith.constant 0 : i32
    return %c0_i32, %c0_i32_0 : i32, i32
  }
  func.func @transform_2(%arg0: i32, %arg1: i32, %arg2: memref<2x1xi32, #tpu.memory_space<smem>>, %arg3: memref<2xi32, #tpu.memory_space<smem>>) -> (i32, i32) {
    %c0_i32 = arith.constant 0 : i32
    %c0_i32_0 = arith.constant 0 : i32
    %c0_i32_1 = arith.constant 0 : i32
    return %c0_i32, %c0_i32_0 : i32, i32
  }
  func.func @transform_3(%arg0: i32, %arg1: i32, %arg2: memref<2x1xi32, #tpu.memory_space<smem>>, %arg3: memref<2xi32, #tpu.memory_space<smem>>) -> (i32, i32) {
    %c0_i32 = arith.constant 0 : i32
    %c0_i32_0 = arith.constant 0 : i32
    %c0_i32_1 = arith.constant 0 : i32
    return %c0_i32, %c0_i32_0 : i32, i32
  }
  func.func @transform_4(%arg0: i32, %arg1: i32, %arg2: memref<2x1xi32, #tpu.memory_space<smem>>, %arg3: memref<2xi32, #tpu.memory_space<smem>>) -> (i32, i32) {
    %c0_i32 = arith.constant 0 : i32
    %c0_i32_0 = arith.constant 0 : i32
    return %arg0, %c0_i32 : i32, i32
  }
}

</mosaic_0001>

<bundles_post_ra>
// kernel: tpu_custom_call.1
= control target key start
LH: loop header
LB: loop body
LE: loop exit
PB: predicated region body
PF: predicated region fallthrough
CT: control target
= control target key end

     0   :  { %s2043_s0 = inlined_call_operand.vmem [shape: s32[2,1], index: 0, kind: input, shape index: {}]   ;;  %s2044_s2 = inlined_call_operand.hbm [shape: s8[256,256], index: 2, kind: input, shape index: {}]   ;;  %s2045_s3 = inlined_call_operand.hbm [shape: bf16[256,128], index: 3, kind: input, shape index: {}]   ;;  %s2046_s4 = inlined_call_operand.hbm [shape: bf16[128,128], index: 4, kind: input, shape index: {}]   ;;  %s2047_s5 = inlined_call_operand.vmem [shape: f32[1,128], index: 5, kind: input, shape index: {}]   ;;  %s2048_s6 = inlined_call_operand.hbm [shape: bf16[256,128], index: 6, kind: output, shape index: {}]   ;;  %s2049_s1 = inlined_call_operand.vmem [shape: s32[2], index: 1, kind: input, shape index: {}]  }
   0x1   :  { %2060 = sst [smem:[#allocation24_spill]] %s2045_s3  ;;  %s11_s23 = sshll.u32 %s2043_s0, 4  ;;  %s12_s23 = int_to_ptr.vmem [resolvable:$true] %s11_s23 }
   0x2   :  { %2061 = sst [smem:[#allocation25_spill]] %s2046_s4  ;;  %s15_s26 = sshll.u32 %s2049_s1, 4  ;;  %s16_s26 = int_to_ptr.vmem [resolvable:$true] %s15_s26 }
   0x3   :  { %s1478_s27 = scalar_lea.vmem %s12_s23, 32  ;;  %p1483_p1 = scmp.lt.s32.totalorder %s12_s23, %s12_s23 }
   0x4   :  { %p1479_p0 = scmp.ne.s32.totalorder %s12_s23, %s1478_s27  ;;  %p1484_p2 = scmp.lt.s32.totalorder %s1478_s27, %s1478_s27 }
   0x6   :  { %p1485_p3 = por %p1484_p2, %p1483_p1 }
   0x8   :  { %p1486_p4 = pnand %p1485_p3, %p1479_p0 }
   0xa   :  { %1489 = shalt.err (!%p1486_p4)  }
   0xb   :  { %s1694_s28 = smov [#allocation4]   ;;  %s1490_s29 = scalar_lea.vmem %s16_s26, 16 }
   0xc   :  { %14 = dma.vmem_to_smem %s12_s23, 32, %s1694_s28, [#allocation3] }
   0xd   :  { %p1491_p5 = scmp.ne.s32.totalorder %s16_s26, %s1490_s29  ;;  %p1495_p6 = scmp.lt.s32.totalorder %s16_s26, %s16_s26 }
   0xe   :  { %p1496_p7 = scmp.lt.s32.totalorder %s1490_s29, %s1490_s29 }
  0x10   :  { %p1497_p8 = por %p1496_p7, %p1495_p6 }
  0x12   :  { %p1498_p9 = pnand %p1497_p8, %p1491_p5 }
  0x14   :  { %1501 = shalt.err (!%p1498_p9)  }
  0x15   :  { %s1695_s0 = smov [#allocation5]  }
  0x16   :  { %18 = dma.vmem_to_smem %s16_s26, 16, %s1695_s0, [#allocation3] }
  0x17   :  { %1644 = dma.done.wait [#allocation3], 48 }
  0x18   :  { %1645 = vsyncadd [#allocation3], 4294967248 }
  0x19   :  { %20 = sfence }
  0x1a   :  { %21 = vsyncpa [#allocation7], 0 }
  0x1b   :  { %23 = vsyncpa [#allocation7 + $0x1], 0 }
  0x1c   :  { %24 = vsyncpa [#allocation10], 0 }
  0x1d   :  { %25 = vsyncpa [#allocation8], 0 }
  0x1e   :  { %27 = vsyncpa [#allocation8 + $0x1], 0  ;;  %s1748_s1 = smov 0   ;;  %s1750_s30 = smov 0  }
  0x1f   :  { %s1752_s7 = smov 0   ;;  %s1754_s8 = smov 0  }
  0x20   :  { %s1756_s9 = smov 0   ;;  %s1758_s10 = smov 0  }
  0x21   :  { %s1760_s11 = smov 0   ;;  %s1762_s12 = smov 0  }
  0x22   :  { %s1764_s13 = smov 0  }
  0x23 LB: > { %2062 = sst [smem:[#allocation19_spill]] %s1668_s7  ;;  %s1055_s14 = sadd.s32 4294967295, %s1692_s13   ;;  %s1692_s13 = sphi %s1764_s13, %s33_s13   ;;  %s1688_s12 = sphi %s1762_s12, %s2094_s12   ;;  %s1684_s11 = sphi %s1760_s11, %s2093_s11   ;;  %s1680_s10 = sphi %s1758_s10, %s2092_s10   ;;  %s1676_s9 = sphi %s1756_s9, %s2091_s9   ;;  %s1672_s8 = sphi %s1754_s8, %s2090_s8   ;;  %s1668_s7 = sphi %s1752_s7, %s2086_s7   ;;  %s1664_s30 = sphi %s1750_s30, %s2089_s30   ;;  %s1660_s1 = sphi %s1748_s1, %s2088_s1  }
  0x24   : > { %2063 = sst [smem:[#allocation20_spill]] %s1692_s13  ;;  %s1056_s15 = sadd.s32 4294967294, %s1692_s13  }
  0x25   : > { %p83_p10 = scmp.ne.s32.totalorder %s1676_s9, %s1672_s8  ;;  %p1794_p11 = scmp.eq.s32.totalorder %s1055_s14, 0 }
  0x26   : > { %p169_p12 = scmp.ne.s32.totalorder %s1668_s7, %s1664_s30  ;;  %p170_p0 = scmp.eq.s32.totalorder %s1055_s14, 1 }
  0x27   : > { %s2064_s16 = scalar_select %p1794_p11, 1, 0 }
  0x28   : > { %p1802_p13 = por %p1794_p11, %p83_p10  ;;  %p175_p1 = scmp.ne.s32.totalorder %s1664_s30, %s1660_s1 }
  0x29   : > { %p176_p2 = scmp.eq.s32.totalorder %s1056_s15, 1  ;;  %p1808_p3 = por %p170_p0, %p169_p12 }
  0x2a   : > { %s2065_s17 = scalar_select %p1802_p13, 1, 0 }
  0x2b   : > { %s2066_s18 = scalar_select %p1808_p3, 1, 0 }
  0x2c   : > { %p1059_p4 = scmp.ge.s32.totalorder %s1692_s13, 1  ;;  %p1813_p5 = por %p176_p2, %p175_p1 }
  0x2d   : > { %p183_p6 = scmp.lt.s32.totalorder %s1692_s13, 3  ;;  %s1696_s21 = smov [#allocation9]  }
  0x2e   : > { %s2067_s19 = scalar_select %p1813_p5, 1, 0 }
  0x2f   : > { %p1818_p7 = pnand %p1059_p4, %p183_p6  ;;  %s195_s22 = sshll.u32 %s1696_s21, 4  ;;  %s196_s22 = int_to_ptr.vmem [resolvable:$true] %s195_s22 }
  0x30   : > { %2068 = sst [smem:[#allocation21_spill]] %s2067_s19  ;;  %s1697_s24 = smov [#allocation11]  }
  0x31   : > { %s2069_s20 = scalar_select %p1818_p7, 1, 0 }
  0x32   : > { %p1348_p8 = pneg %p1818_p7  ;;  %s208_s25 = sshll.u32 %s1697_s24, 4  ;;  %s209_s25 = int_to_ptr.vmem [resolvable:$true] %s208_s25 }
  0x33   : > { %s1513_s26 = scalar_lea.vmem %s196_s22, 2048  ;;  %p1521_p4 = scmp.lt.s32.totalorder %s196_s22, %s196_s22 }
  0x34   : > { %p1827_p10 = pnand %p1348_p8, %p1794_p11  ;;  %p1514_p0 = scmp.ne.s32.totalorder %s196_s22, %s1513_s26 }
  0x35   : > { %p1522_p6 = scmp.lt.s32.totalorder %s1513_s26, %s1513_s26 }
  0x36   : > { %p1504_p12 = pneg %p1827_p10 }
  0x37   : > { %p1523_p9 = por %p1522_p6, %p1521_p4 }
  0x38   : > { %p1516_p1 = pnand %p1514_p0, %p1504_p12 }
  0x3a   : > { %p1517_p2 = pneg %p1516_p1 }
  0x3c   : > { %p1524_p8 = pnand %p1523_p9, %p1517_p2 }
  0x3e   : > { %1527 = shalt.err (!%p1524_p8)
}
  0x3f   : > { %s1698_s27 = smov 64   ;;  %s1699_s28 = smov 4  }
  0x40   : > { %s2071_s3 = sld [smem:[#allocation24_spill]]  ;;  %s1539_s8 = scalar_lea.vmem %s209_s25, 1024 }
  0x41   : > { %p1540_p5 = scmp.ne.s32.totalorder %s209_s25, %s1539_s8  ;;  %p1547_p3 = scmp.lt.s32.totalorder %s209_s25, %s209_s25 }
  0x42   : > { %p1548_p11 = scmp.lt.s32.totalorder %s1539_s8, %s1539_s8 }
  0x43   : > { %p1542_p0 = pnand %p1540_p5, %p1504_p12 }
  0x44   : > { %p1549_p4 = por %p1548_p11, %p1547_p3 }
  0x45   : > { %p1543_p1 = pneg %p1542_p0 }
  0x46   : > { %1351 = dma.hbm_to_vmem [thread:$0]  (!%p1827_p10), %s2071_s3, 2048, %s196_s22, [#allocation10], %s1698_s27, %s1698_s27, %s1699_s28  }
  0x47   : > { %p1550_p9 = pnand %p1549_p4, %p1543_p1 }
  0x49   : > { %1553 = shalt.err (!%p1550_p9)
}
  0x4a   : > { %s2072_s4 = sld [smem:[#allocation25_spill]]  ;;  %s45_s21 = sadd.s32 1, %s1688_s12 }
  0x4b   : > { %p47_p11 = scmp.ge.s32.totalorder %s45_s21, 2  ;;  %s1057_s22 = sshll.u32 %s1688_s12, 7 }
  0x4c   : > { %p77_p3 = scmp.ne.s32.totalorder %s1680_s10, %s1676_s9  ;;  %s56_s23 = sld [smem:[#allocation4 + %s1057_s22]] }
  0x4d   : > { %s2096_s21 = smov (%p47_p11, %s45_s21), 0  ;;  %p78_p5 = scmp.eq.s32.totalorder %s1692_s13, 0 }
  0x4e   : > { %2073 = sst [smem:[#allocation22_spill]] %s2096_s21  ;;  %s1058_s24 = sshll.u32 %s2096_s21, 7 }
  0x4f   : > { %s65_s26 = ssub.s32 %s1688_s12, %s2096_s21  ;;  %s159_s29 = sadd.s32 1, %s1668_s7 }
  0x50   : > { %1354 = dma.hbm_to_vmem [thread:$0]  (!%p1827_p10), %s2072_s4, 1024, %s209_s25, [#allocation10], %s1698_s27, %s1698_s27, %s1699_s28  }
  0x51   : > { %s64_s0 = sld [smem:[#allocation4 + %s1058_s24]]  ;;  %p1860_p12 = por %p78_p5, %p77_p3 }
  0x52   : > { %p157_p10 = scmp.eq.s32.totalorder %s65_s26, 0  ;;  %s70_s27 = sadd.s32 1, %s1680_s10 }
  0x53   : > { %s225_s28 = sand.u32 1, %s1680_s10   ;;  %p1367_p2 = scmp.lt.s32.totalorder %s1692_s13, 2 }
  0x54   : > { %s1865_s25 = scalar_select %p157_p10, %s1668_s7, %s159_s29  }
  0x55   : > { %s1338_s14 = scalar_select %p1860_p12, [#allocation4], [#allocation13] }
  0x56   : > { %2075 = sst [smem:[#allocation23_spill]] %s1865_s25  ;;  %s1063_s4 = sshll.u32 %s225_s28, 6 }
  0x57   : > { %s66_s15 = ssub.s32 %s56_s23, %s64_s0  ;;  %p1874_p8 = pnand %p1367_p2, %p1860_p12 }
  0x58   : > { %s67_s3 = sor.u32 %s66_s15, %s65_s26  ;;  %s2098_s22 = smov (!%p1860_p12, %s1057_s22), 0 }
  0x59   : > { %p68_p6 = scmp.eq.s32.totalorder %s67_s3, 0  ;;  %s2100_s14 = smov (!%p1367_p2, %s1338_s14), [#allocation14] }
  0x5a   : > { %s2102_s22 = smov (!%p1367_p2, %s2098_s22), 0  ;;  %s229_s25 = scalar_lea.vmem [#allocation6], %s1063_s4 }
  0x5b   : > { %s1881_s29 = scalar_select %p68_p6, %s1680_s10, %s70_s27  }
  0x5c   : > { %s237_s21 = sld [smem:[%s2100_s14 + %s2102_s22]]  ;;  %s247_s7 = sshll.u32 %s229_s25, 4  ;;  %s1884_s7 = int_to_ptr.vmem [resolvable:$true] %s247_s7 }
  0x5d   : > { %s1125_s23 = sshll.u32 %s1688_s12, 3  ;;  %s1891_s8 = scalar_lea.sflag [#allocation7], %s225_s28 }
  0x5e   : > { %p1556_p1 = pneg %p1874_p8  ;;  %s1559_s22 = scalar_lea.hbm %s2044_s2, 2048 }
  0x62   : > { %s1066_s26 = sshll.u32 %s237_s21, 1 }
  0x63   : > { %s244_s3 = sadd.s32 %s1125_s23, %s1066_s26 }
  0x64   : > { %s1068_s0 = sshll.u32 %s244_s3, 7 }
  0x65   : > { %s1889_s19 = scalar_lea.hbm %s2044_s2, %s1068_s0 }
  0x66   : > { %s1554_s27 = scalar_lea.hbm %s1889_s19, 1024  ;;  %p1560_p11 = scmp.lt.s32.totalorder %s1889_s19, %s2044_s2 }
  0x67   : > { %p1555_p0 = scmp.ne.s32.totalorder %s1889_s19, %s1554_s27  ;;  %p1561_p3 = scmp.lt.s32.totalorder %s1559_s22, %s1554_s27 }
  0x69   : > { %p1557_p4 = pnand %p1556_p1, %p1555_p0  ;;  %p1562_p5 = por %p1561_p3, %p1560_p11 }
  0x6b   : > { %p1558_p9 = pneg %p1557_p4 }
  0x6d   : > { %p1563_p12 = pnand %p1562_p5, %p1558_p9 }
  0x6f   : > { %1566 = shalt.err (!%p1563_p12)
}
  0x70   : > { %s1567_s13 = scalar_lea.vmem %s1884_s7, 1024  ;;  %s1700_s28 = smov [#allocation6]  }
  0x71   : > { %p1568_p10 = scmp.ne.s32.totalorder %s1884_s7, %s1567_s13  ;;  %s1572_s23 = sshll.u32 %s1700_s28, 4  ;;  %s1573_s23 = int_to_ptr.vmem [resolvable:$false] %s1572_s23 }
  0x72   : > { %s1574_s26 = scalar_lea.vmem %s1573_s23, 2048  ;;  %p1575_p0 = scmp.lt.s32.totalorder %s1884_s7, %s1573_s23 }
  0x73   : > { %p1570_p2 = pnand %p1568_p10, %p1556_p1  ;;  %p1576_p4 = scmp.lt.s32.totalorder %s1574_s26, %s1567_s13 }
  0x75   : > { %p1571_p6 = pneg %p1570_p2  ;;  %p1577_p13 = por %p1576_p4, %p1575_p0 }
  0x77   : > { %p1578_p7 = pnand %p1577_p13, %p1571_p6 }
  0x79   : > { %1581 = shalt.err (!%p1578_p7)
}
  0x7a   : > { %s1701_s3 = smov 256   ;;  %s1702_s0 = smov 16  }
  0x7b   : > { %1360 = dma.hbm_to_vmem [thread:$0]  (!%p1874_p8), %s1889_s19, 1024, %s1884_s7, %s1891_s8, %s1701_s3, %s1701_s3, %s1702_s0  }
  0x7c   : > { %p2077_p1 = scmp.ne.s32.totalorder %s2069_s20, 0 }
  0x7d   : > { %s261_s15 = sand.u32 (!%p2077_p1), 1, %s1676_s9   ;;  %p2078_p13 = scmp.ne.s32.totalorder (!%p2077_p1), %s2065_s17, 0 }
  0x7e   : > { %259 = sbr.rel (%p2077_p1) target bundleno = 674 (0x2a2), region = 36  ;;  %s1070_s27 = sshll.u32 (!%p2077_p1), %s261_s15, 6 }
  0x7f   : > { %s262_s4 = scalar_lea.sflag (!%p2077_p1), [#allocation7], %s261_s15  ;;  %s1915_s21 = scalar_lea.vmem (!%p2077_p1), [#allocation6], %s1070_s27 }
  0x83   : > { %1647 = dma.done.wait (%p2078_p13), %s262_s4, 1024  }
  0x84   : > { %1649 = vsyncadd (%p2078_p13), %s262_s4, 4294966272  ;;  %p2079_p7 = scmp.ne.s32.totalorder %s2064_s16, 0 }
  0x86   : > { %1651 = dma.done.wait (%p2079_p7), [#allocation10], 3072  }
  0x87   : > { %1653 = vsyncadd (%p2079_p7), [#allocation10], 4294964224  ;;  %s295_s7 = sand.u32 1, %s1664_s30   ;;  %s330_s19 = sld [smem:[#allocation5 + %s1684_s11]]  ;;  %v1703_v0 = vmov 0.0  }
  0x88   : > { %s1073_s20 = sshll.u32 %s295_s7, 6  ;;  %314 = vst [vmem:[#allocation2 + $0x30] sm:$0xff] %v1703_v0  ;;  %315 = vst [vmem:[#allocation2] sm:$0xff] %v1703_v0 }
  0x89   : > { %316 = vst [vmem:[#allocation2 + $0x58] sm:$0xff] %v1703_v0  ;;  %317 = vst [vmem:[#allocation2 + $0x18] sm:$0xff] %v1703_v0  ;;  %s1929_s16 = scalar_lea.vmem [#allocation12], %s1073_s20 }
  0x8a   : > { %318 = vst [vmem:[#allocation2 + $0x50] sm:$0xff] %v1703_v0  ;;  %319 = vst [vmem:[#allocation2 + $0x68] sm:$0xff] %v1703_v0 }
  0x8b   : > { %320 = vst [vmem:[#allocation2 + $0x8] sm:$0xff] %v1703_v0  ;;  %321 = vst [vmem:[#allocation2 + $0x48] sm:$0xff] %v1703_v0 }
  0x8c   : > { %322 = vst [vmem:[#allocation2 + $0x40] sm:$0xff] %v1703_v0  ;;  %323 = vst [vmem:[#allocation2 + $0x20] sm:$0xff] %v1703_v0 }
  0x8d   : > { %324 = vst [vmem:[#allocation2 + $0x10] sm:$0xff] %v1703_v0  ;;  %325 = vst [vmem:[#allocation2 + $0x38] sm:$0xff] %v1703_v0  ;;  %p1075_p8 = scmp.le.s32.totalorder %s330_s19, 0 }
  0x8e   : > { %326 = vst [vmem:[#allocation2 + $0x60] sm:$0xff] %v1703_v0  ;;  %327 = vst [vmem:[#allocation2 + $0x70] sm:$0xff] %v1703_v0  ;;  %s1076_s17 = sshll.u32 (!%p1075_p8), %s1684_s11, 7 }
  0x8f   : > { %328 = vst [vmem:[#allocation2 + $0x78] sm:$0xff] %v1703_v0  ;;  %329 = vst [vmem:[#allocation2 + $0x28] sm:$0xff] %v1703_v0  ;;  %334 = sbr.rel (%p1075_p8) target bundleno = 414 (0x19e), region = 56  ;;  %s366_s24 = sld [smem:[#allocation4 + %s1076_s17]] (!%p1075_p8) }
  0x94   : > { %v1933_v1 = vld [vmem:[%s1915_s21 + $0x8] sm:$0xff]  ;;  %v335_v21 = vld [vmem:[%s1915_s21] sm:$0xff]  ;;  %v338_v27 = vld [vmem:[%s1915_s21 + $0x18] sm:$0xff] }
  0x95   : > { %v1936_v2 = vld [vmem:[%s1915_s21 + $0x28] sm:$0xff]  ;;  %v344_v3 = vunpack.c.l.s8.bf16 %v1933_v1  ;;  %s1077_s8 = sshll.u32 %s366_s24, 8  ;;  %v339_v22 = vld [vmem:[%s1915_s21 + $0x20] sm:$0xff]  ;;  %v343_v23 = vunpack.c.l.s8.bf16 %v335_v21  ;;  %v346_v25 = vunpack.c.h.s8.bf16 %v1933_v1  ;;  %v342_v28 = vld [vmem:[%s1915_s21 + $0x38] sm:$0xff]  ;;  %v345_v29 = vunpack.c.h.s8.bf16 %v335_v21 }
  0x96   : > { %v352_v4 = vunpack.c.l.s8.bf16 %v1936_v2  ;;  %s368_s22 = sshra.s32 %s1077_s8, 3  ;;  %v351_v24 = vunpack.c.l.s8.bf16 %v339_v22  ;;  %v354_v26 = vunpack.c.h.s8.bf16 %v1936_v2  ;;  %v353_v30 = vunpack.c.h.s8.bf16 %v339_v22  ;;  %v337_v33 = vld [vmem:[%s1915_s21 + $0x10] sm:$0xff]  ;;  %v412_v45 = vld [vmem:[#allocation2 + $0x40] sm:$0xff]  ;;  %v406_v63 = vld [vmem:[#allocation2 + $0x58] sm:$0xff] }
  0x97   : > { %548 = vmatprep.mubr.bf16.mxu0 %v344_v3  ;;  %s1078_s25 = sshll.u32 %s368_s22, 2  ;;  %v348_v31 = vunpack.c.l.s8.bf16 %v338_v27  ;;  %v356_v32 = vunpack.c.l.s8.bf16 %v342_v28  ;;  %v341_v34 = vld [vmem:[%s1915_s21 + $0x30] sm:$0xff]  ;;  %v347_v35 = vunpack.c.l.s8.bf16 %v337_v33  ;;  %v350_v37 = vunpack.c.h.s8.bf16 %v338_v27  ;;  %v405_v53 = vld [vmem:[#allocation2] sm:$0xff] }
  0x98   : > { %580 = vmatprep.mubr.bf16.mxu1 %v352_v4  ;;  %s1940_s14 = scalar_lea.vmem [#allocation9], %s1078_s25  ;;  %v355_v36 = vunpack.c.l.s8.bf16 %v341_v34  ;;  %v358_v38 = vunpack.c.h.s8.bf16 %v342_v28  ;;  %v349_v39 = vunpack.c.h.s8.bf16 %v337_v33  ;;  %v357_v40 = vunpack.c.h.s8.bf16 %v341_v34  ;;  %v404_v43 = vld [vmem:[#allocation2 + $0x30] sm:$0xff]  ;;  %v413_v55 = vld [vmem:[#allocation2 + $0x20] sm:$0xff] }
  0x99   : > { %v1454_v5 = vld [vmem:[%s1940_s14 + $0x78] sm:$0xff]   ;;  %v1456_v7 = vld [vmem:[%s1940_s14 + $0x70] sm:$0xff]   ;;  %v1458_v9 = vld [vmem:[%s1940_s14 + $0x68] sm:$0xff]  }
  0x9a   : > { %v1455_v6 = vld [vmem:[%s1940_s14 + $0x38] sm:$0xff]   ;;  %1190 = vmatprep.subr.bf16.mxu0 %v1454_v5  ;;  %1302 = vmatprep.subr.bf16.mxu1 %v1454_v5  ;;  %v1457_v8 = vld [vmem:[%s1940_s14 + $0x30] sm:$0xff]   ;;  %v1459_v10 = vld [vmem:[%s1940_s14 + $0x28] sm:$0xff]  }
  0x9b   : > { %1191 = vmatpush3.bf16.msra.mxu0 %v1455_v6  ;;  %1310 = vmatpush3.bf16.msra.mxu1 %v1455_v6  ;;  %v1460_v11 = vld [vmem:[%s1940_s14 + $0x60] sm:$0xff]   ;;  %v1462_v13 = vld [vmem:[%s1940_s14 + $0x58] sm:$0xff]   ;;  %v1464_v15 = vld [vmem:[%s1940_s14 + $0x50] sm:$0xff]  }
  0x9c   : > { %1192 = vmatprep.subr.bf16.mxu0 %v1456_v7  ;;  %1303 = vmatprep.subr.bf16.mxu1 %v1456_v7  ;;  %v1461_v12 = vld [vmem:[%s1940_s14 + $0x20] sm:$0xff]   ;;  %v1463_v14 = vld [vmem:[%s1940_s14 + $0x18] sm:$0xff]   ;;  %v1465_v16 = vld [vmem:[%s1940_s14 + $0x10] sm:$0xff]  }
  0x9d   : > { %v1466_v17 = vld [vmem:[%s1940_s14 + $0x48] sm:$0xff]   ;;  %v1468_v19 = vld [vmem:[%s1940_s14 + $0x40] sm:$0xff]   ;;  %v414_v1 = vld [vmem:[#allocation2 + $0x10] sm:$0xff] }
  0x9e   : > { %v1467_v18 = vld [vmem:[%s1940_s14 + $0x8] sm:$0xff]   ;;  %v1469_v20 = vld [vmem:[%s1940_s14] sm:$0xff]  }
  0x9f   : > { %1193 = vmatpush3.bf16.msra.mxu0 %v1457_v8  ;;  %1311 = vmatpush3.bf16.msra.mxu1 %v1457_v8  ;;  %v416_v21 = vld [vmem:[#allocation2 + $0x60] sm:$0xff] }
  0xa0   : > { %1194 = vmatprep.subr.bf16.mxu0 %v1458_v9  ;;  %1304 = vmatprep.subr.bf16.mxu1 %v1458_v9  ;;  %v407_v9 = vld [vmem:[#allocation2 + $0x18] sm:$0xff] }
  0xa3   : > { %1195 = vmatpush3.bf16.msra.mxu0 %v1459_v10  ;;  %1312 = vmatpush3.bf16.msra.mxu1 %v1459_v10 }
  0xa4   : > { %1196 = vmatprep.subr.bf16.mxu0 %v1460_v11  ;;  %1305 = vmatprep.subr.bf16.mxu1 %v1460_v11  ;;  %v415_v11 = vld [vmem:[#allocation2 + $0x38] sm:$0xff] }
  0xa7   : > { %1197 = vmatpush3.bf16.msra.mxu0 %v1461_v12  ;;  %1313 = vmatpush3.bf16.msra.mxu1 %v1461_v12 }
  0xa8   : > { %1198 = vmatprep.subr.bf16.mxu0 %v1462_v13  ;;  %1306 = vmatprep.subr.bf16.mxu1 %v1462_v13 }
  0xab   : > { %1199 = vmatpush3.bf16.msra.mxu0 %v1463_v14  ;;  %1314 = vmatpush3.bf16.msra.mxu1 %v1463_v14 }
  0xac   : > { %1200 = vmatprep.subr.bf16.mxu0 %v1464_v15  ;;  %1307 = vmatprep.subr.bf16.mxu1 %v1464_v15 }
  0xaf   : > { %1201 = vmatpush3.bf16.msra.mxu0 %v1465_v16  ;;  %1315 = vmatpush3.bf16.msra.mxu1 %v1465_v16 }
  0xb0   : > { %1202 = vmatprep.subr.bf16.mxu0 %v1466_v17  ;;  %1308 = vmatprep.subr.bf16.mxu1 %v1466_v17 }
  0xb3   : > { %1203 = vmatpush3.bf16.msra.mxu0 %v1467_v18  ;;  %1316 = vmatpush3.bf16.msra.mxu1 %v1467_v18 }
  0xb4   : > { %1204 = vmatprep.subr.bf16.mxu0 %v1468_v19  ;;  %1309 = vmatprep.subr.bf16.mxu1 %v1468_v19  ;;  %v408_v19 = vld [vmem:[#allocation2 + $0x50] sm:$0xff] }
  0xb7   : > { %1205 = vmatpush3.bf16.msra.mxu0 %v1469_v20  ;;  %1317 = vmatpush3.bf16.msra.mxu1 %v1469_v20 }
  0xba   : > { %549 = vmatmul.mubr.bf16.vlgmr.msra.gmra.mxu0 %v343_v23  ;;  %581 = vmatmul.mubr.bf16.vlgmr.msra.gmra.mxu1 %v351_v24 }
  0xbb   : > { %556 = vmatprep.mubr.bf16.mxu0 %v346_v25  ;;  %588 = vmatprep.mubr.bf16.mxu1 %v354_v26 }
  0xc2   : > { %557 = vmatmul.mubr.bf16.gmra.mxu0 %v345_v29  ;;  %589 = vmatmul.mubr.bf16.gmra.mxu1 %v353_v30  ;;  %v409_v29 = vld [vmem:[#allocation2 + $0x68] sm:$0xff] }
  0xc3   : > { %564 = vmatprep.mubr.bf16.mxu0 %v348_v31  ;;  %596 = vmatprep.mubr.bf16.mxu1 %v356_v32  ;;  %v417_v31 = vld [vmem:[#allocation2 + $0x70] sm:$0xff] }
  0xca   : > { %565 = vmatmul.mubr.bf16.gmra.mxu0 %v347_v35  ;;  %597 = vmatmul.mubr.bf16.gmra.mxu1 %v355_v36 }
  0xcb   : > { %572 = vmatprep.mubr.bf16.mxu0 %v350_v37  ;;  %604 = vmatprep.mubr.bf16.mxu1 %v358_v38 }
  0xd2   : > { %573 = vmatmul.mubr.bf16.gmra.mxu0 %v349_v39  ;;  %605 = vmatmul.mubr.bf16.gmra.mxu1 %v357_v40  ;;  %v410_v39 = vld [vmem:[#allocation2 + $0x8] sm:$0xff] }
 0x17a   : > { %v1206_v41 = vpop.f32.mrf.mxu0  ;;  %v1230_v42 = vpop.f32.mrf.mxu1 }
 0x17c   : > { %v1207_v44 = vpop.f32.mrf.mxu0  ;;  %v1231_v46 = vpop.f32.mrf.mxu1 }
 0x17d   : > { %v1208_v47 = vadd.f32 %v1207_v44, %v1206_v41  ;;  %v1232_v48 = vadd.f32 %v1231_v46, %v1230_v42  ;;  %v418_v41 = vld [vmem:[#allocation2 + $0x78] sm:$0xff] }
 0x17e   : > { %v1209_v49 = vpop.f32.mrf.mxu0  ;;  %v1233_v50 = vpop.f32.mrf.mxu1 }
 0x17f   : > { %v613_v51 = vadd.f32 %v1208_v47, %v404_v43  ;;  %v621_v52 = vadd.f32 %v1232_v48, %v412_v45 }
 0x180   : > { %v1210_v54 = vpop.f32.mrf.mxu0  ;;  %v1234_v56 = vpop.f32.mrf.mxu1 }
 0x181   : > { %629 = vst [vmem:[#allocation2 + $0x30] sm:$0xff] %v613_v51  ;;  %637 = vst [vmem:[#allocation2 + $0x40] sm:$0xff] %v621_v52  ;;  %v1211_v57 = vadd.f32 %v1210_v54, %v1209_v49  ;;  %v1235_v58 = vadd.f32 %v1234_v56, %v1233_v50  ;;  %v411_v49 = vld [vmem:[#allocation2 + $0x48] sm:$0xff] }
 0x182   : > { %v1212_v59 = vpop.f32.mrf.mxu0  ;;  %v1236_v60 = vpop.f32.mrf.mxu1  ;;  %v419_v51 = vld [vmem:[#allocation2 + $0x28] sm:$0xff] }
 0x183   : > { %v614_v61 = vadd.f32 %v1211_v57, %v405_v53  ;;  %v622_v62 = vadd.f32 %v1235_v58, %v413_v55 }
 0x184   : > { %v1213_v0 = vpop.f32.mrf.mxu0  ;;  %v1237_v2 = vpop.f32.mrf.mxu1 }
 0x185   : > { %630 = vst [vmem:[#allocation2] sm:$0xff] %v614_v61  ;;  %638 = vst [vmem:[#allocation2 + $0x20] sm:$0xff] %v622_v62  ;;  %v1214_v3 = vadd.f32 %v1213_v0, %v1212_v59  ;;  %v1238_v4 = vadd.f32 %v1237_v2, %v1236_v60 }
 0x186   : > { %v1215_v5 = vpop.f32.mrf.mxu0  ;;  %v1239_v6 = vpop.f32.mrf.mxu1 }
 0x187   : > { %v615_v7 = vadd.f32 %v1214_v3, %v406_v63  ;;  %v623_v8 = vadd.f32 %v1238_v4, %v414_v1 }
 0x188   : > { %v1216_v10 = vpop.f32.mrf.mxu0  ;;  %v1240_v12 = vpop.f32.mrf.mxu1 }
 0x189   : > { %631 = vst [vmem:[#allocation2 + $0x58] sm:$0xff] %v615_v7  ;;  %639 = vst [vmem:[#allocation2 + $0x10] sm:$0xff] %v623_v8  ;;  %v1217_v13 = vadd.f32 %v1216_v10, %v1215_v5  ;;  %v1241_v14 = vadd.f32 %v1240_v12, %v1239_v6 }
 0x18a   : > { %v1218_v15 = vpop.f32.mrf.mxu0  ;;  %v1242_v16 = vpop.f32.mrf.mxu1 }
 0x18b   : > { %v616_v17 = vadd.f32 %v1217_v13, %v407_v9  ;;  %v624_v18 = vadd.f32 %v1241_v14, %v415_v11 }
 0x18c   : > { %v1219_v20 = vpop.f32.mrf.mxu0  ;;  %v1243_v22 = vpop.f32.mrf.mxu1 }
 0x18d   : > { %632 = vst [vmem:[#allocation2 + $0x18] sm:$0xff] %v616_v17  ;;  %640 = vst [vmem:[#allocation2 + $0x38] sm:$0xff] %v624_v18  ;;  %v1220_v23 = vadd.f32 %v1219_v20, %v1218_v15  ;;  %v1244_v24 = vadd.f32 %v1243_v22, %v1242_v16 }
 0x18e   : > { %v1221_v25 = vpop.f32.mrf.mxu0  ;;  %v1245_v26 = vpop.f32.mrf.mxu1 }
 0x18f   : > { %v617_v27 = vadd.f32 %v1220_v23, %v408_v19  ;;  %v625_v28 = vadd.f32 %v1244_v24, %v416_v21 }
 0x190   : > { %v1222_v30 = vpop.f32.mrf.mxu0  ;;  %v1246_v32 = vpop.f32.mrf.mxu1 }
 0x191   : > { %633 = vst [vmem:[#allocation2 + $0x50] sm:$0xff] %v617_v27  ;;  %641 = vst [vmem:[#allocation2 + $0x60] sm:$0xff] %v625_v28  ;;  %v1223_v33 = vadd.f32 %v1222_v30, %v1221_v25  ;;  %v1247_v34 = vadd.f32 %v1246_v32, %v1245_v26 }
 0x192   : > { %v1224_v35 = vpop.f32.mrf.mxu0  ;;  %v1248_v36 = vpop.f32.mrf.mxu1 }
 0x193   : > { %v618_v37 = vadd.f32 %v1223_v33, %v409_v29  ;;  %v626_v38 = vadd.f32 %v1247_v34, %v417_v31 }
 0x194   : > { %v1225_v40 = vpop.f32.mrf.mxu0  ;;  %v1249_v42 = vpop.f32.mrf.mxu1 }
 0x195   : > { %634 = vst [vmem:[#allocation2 + $0x68] sm:$0xff] %v618_v37  ;;  %642 = vst [vmem:[#allocation2 + $0x70] sm:$0xff] %v626_v38  ;;  %v1226_v43 = vadd.f32 %v1225_v40, %v1224_v35  ;;  %v1250_v44 = vadd.f32 %v1249_v42, %v1248_v36 }
 0x196   : > { %v1227_v45 = vpop.f32.mrf.mxu0  ;;  %v1251_v46 = vpop.f32.mrf.mxu1 }
 0x197   : > { %v619_v47 = vadd.f32 %v1226_v43, %v410_v39  ;;  %v627_v48 = vadd.f32 %v1250_v44, %v418_v41 }
 0x198   : > { %v1228_v50 = vpop.f32.mrf.mxu0  ;;  %v1252_v52 = vpop.f32.mrf.mxu1 }
 0x199   : > { %635 = vst [vmem:[#allocation2 + $0x8] sm:$0xff] %v619_v47  ;;  %643 = vst [vmem:[#allocation2 + $0x78] sm:$0xff] %v627_v48  ;;  %v1229_v53 = vadd.f32 %v1228_v50, %v1227_v45  ;;  %v1253_v54 = vadd.f32 %v1252_v52, %v1251_v46 }
 0x19b   : > { %v620_v55 = vadd.f32 %v1229_v53, %v411_v49  ;;  %v628_v56 = vadd.f32 %v1253_v54, %v419_v51 }
 0x19d   : > { %636 = vst [vmem:[#allocation2 + $0x48] sm:$0xff] %v620_v55  ;;  %644 = vst [vmem:[#allocation2 + $0x28] sm:$0xff] %v628_v56 }
 0x19e PF: > { %v1470_v57 = vld [vmem:[#allocation11 + $0x38] sm:$0xff]   ;;  %v1471_v58 = vld [vmem:[#allocation11 + $0x30] sm:$0xff]   ;;  %v1472_v59 = vld [vmem:[#allocation11 + $0x28] sm:$0xff]   ;;  %s1142_s23 = sshll.u32 %s1684_s11, 10  ;;  %s950_s26 = sshll.u32 %s1929_s16, 4  ;;  %s1980_s26 = int_to_ptr.vmem [resolvable:$true] %s950_s26 }
 0x19f   : > { %1270 = vmatprep.subr.bf16.mxu0 %v1470_v57  ;;  %1318 = vmatprep.subr.bf16.mxu1 %v1470_v57  ;;  %v1473_v60 = vld [vmem:[#allocation11 + $0x20] sm:$0xff]   ;;  %v648_v61 = vld [vmem:[#allocation2 + $0x30] sm:$0xff]  ;;  %v1474_v3 = vld [vmem:[#allocation11 + $0x18] sm:$0xff]   ;;  %s1978_s15 = scalar_lea.hbm %s2048_s6, %s1142_s23  ;;  %s1988_s11 = scalar_lea.sflag [#allocation8], %s295_s7 }
 0x1a0   : > { %1271 = vmatpush3.bf16.msra.mxu0 %v1470_v57  ;;  %1326 = vmatpush3.bf16.msra.mxu1 %v1470_v57  ;;  %v649_v62 = vld [vmem:[#allocation2] sm:$0xff]  ;;  %v1475_v4 = vld [vmem:[#allocation11 + $0x10] sm:$0xff]   ;;  %v1476_v5 = vld [vmem:[#allocation11 + $0x8] sm:$0xff]   ;;  %s1582_s27 = scalar_lea.vmem %s1980_s26, 1024  ;;  %p2080_p11 = scmp.ne.s32.totalorder %s2066_s18, 0 }
 0x1a1   : > { %1272 = vmatprep.subr.bf16.mxu0 %v1471_v58  ;;  %1319 = vmatprep.subr.bf16.mxu1 %v1471_v58  ;;  %v656_v63 = vld [vmem:[#allocation2 + $0x40] sm:$0xff]  ;;  %v664_v0 = vpack.c.bf16 %v649_v62, %v648_v61  ;;  %v650_v7 = vld [vmem:[#allocation2 + $0x58] sm:$0xff]  ;;  %v658_v9 = vld [vmem:[#allocation2 + $0x10] sm:$0xff]  ;;  %p1583_p9 = scmp.ne.s32.totalorder %s1980_s26, %s1582_s27  ;;  %s1704_s4 = smov [#allocation12]  }
 0x1a2   : > { %v657_v1 = vld [vmem:[#allocation2 + $0x20] sm:$0xff]  ;;  %v651_v8 = vld [vmem:[#allocation2 + $0x18] sm:$0xff]  ;;  %v652_v11 = vld [vmem:[#allocation2 + $0x50] sm:$0xff]  ;;  %s1586_s21 = sshll.u32 %s1704_s4, 4  ;;  %s1587_s21 = int_to_ptr.vmem [resolvable:$false] %s1586_s21 }
 0x1a3   : > { %v668_v2 = vpack.c.bf16 %v657_v1, %v656_v63  ;;  %1286 = vmatprep.mubr.bf16.mxu0 %v664_v0  ;;  %v1477_v6 = vld [vmem:[#allocation11] sm:$0xff]   ;;  %v659_v10 = vld [vmem:[#allocation2 + $0x38] sm:$0xff]  ;;  %v653_v12 = vld [vmem:[#allocation2 + $0x68] sm:$0xff]  ;;  %v665_v15 = vpack.c.bf16 %v651_v8, %v650_v7  ;;  %p1584_p3 = pnand %p1583_p9, %p2080_p11  ;;  %s1588_s19 = scalar_lea.vmem %s1587_s21, 2048 }
 0x1a4   : > { %1273 = vmatpush3.bf16.msra.mxu0 %v1471_v58  ;;  %1327 = vmatpush3.bf16.msra.mxu1 %v1471_v58  ;;  %v660_v13 = vld [vmem:[#allocation2 + $0x60] sm:$0xff]  ;;  %v661_v14 = vld [vmem:[#allocation2 + $0x70] sm:$0xff]  ;;  %v669_v16 = vpack.c.bf16 %v659_v10, %v658_v9  ;;  %v666_v17 = vpack.c.bf16 %v653_v12, %v652_v11  ;;  %v654_v19 = vld [vmem:[#allocation2 + $0x8] sm:$0xff]  ;;  %p1589_p12 = scmp.lt.s32.totalorder %s1980_s26, %s1587_s21  ;;  %p1590_p10 = scmp.lt.s32.totalorder %s1588_s19, %s1582_s27 }
 0x1a5   : > { %1274 = vmatprep.subr.bf16.mxu0 %v1472_v59  ;;  %1320 = vmatprep.subr.bf16.mxu1 %v1472_v59  ;;  %v670_v18 = vpack.c.bf16 %v661_v14, %v660_v13  ;;  %v655_v20 = vld [vmem:[#allocation2 + $0x48] sm:$0xff]  ;;  %v662_v21 = vld [vmem:[#allocation2 + $0x78] sm:$0xff]  ;;  %v1095_v25 = vld [vmem:[%s2047_s5] ss:$0 sm:$0xff]  ;;  %p1585_p5 = pneg %p1584_p3 }
 0x1a6   : > { %1294 = vmatprep.mubr.bf16.mxu1 %v668_v2  ;;  %v663_v22 = vld [vmem:[#allocation2 + $0x28] sm:$0xff]  ;;  %v667_v23 = vpack.c.bf16 %v655_v20, %v654_v19  ;;  %p1591_p2 = por %p1590_p10, %p1589_p12 }
 0x1a7   : > { %v671_v24 = vpack.c.bf16 %v663_v22, %v662_v21 }
 0x1a8   : > { %1275 = vmatpush3.bf16.msra.mxu0 %v1472_v59  ;;  %1328 = vmatpush3.bf16.msra.mxu1 %v1472_v59  ;;  %p1592_p6 = pnand %p1591_p2, %p1585_p5 }
 0x1a9   : > { %1276 = vmatprep.subr.bf16.mxu0 %v1473_v60  ;;  %1321 = vmatprep.subr.bf16.mxu1 %v1473_v60 }
 0x1ac   : > { %1277 = vmatpush3.bf16.msra.mxu0 %v1473_v60  ;;  %1329 = vmatpush3.bf16.msra.mxu1 %v1473_v60 }
 0x1ad   : > { %1278 = vmatprep.subr.bf16.mxu0 %v1474_v3  ;;  %1322 = vmatprep.subr.bf16.mxu1 %v1474_v3 }
 0x1b0   : > { %1279 = vmatpush3.bf16.msra.mxu0 %v1474_v3  ;;  %1330 = vmatpush3.bf16.msra.mxu1 %v1474_v3 }
 0x1b1   : > { %1280 = vmatprep.subr.bf16.mxu0 %v1475_v4  ;;  %1323 = vmatprep.subr.bf16.mxu1 %v1475_v4 }
 0x1b4   : > { %1281 = vmatpush3.bf16.msra.mxu0 %v1475_v4  ;;  %1331 = vmatpush3.bf16.msra.mxu1 %v1475_v4 }
 0x1b5   : > { %1282 = vmatprep.subr.bf16.mxu0 %v1476_v5  ;;  %1324 = vmatprep.subr.bf16.mxu1 %v1476_v5 }
 0x1b8   : > { %1283 = vmatpush3.bf16.msra.mxu0 %v1476_v5  ;;  %1332 = vmatpush3.bf16.msra.mxu1 %v1476_v5 }
 0x1b9   : > { %1284 = vmatprep.subr.bf16.mxu0 %v1477_v6  ;;  %1325 = vmatprep.subr.bf16.mxu1 %v1477_v6 }
 0x1bc   : > { %1285 = vmatpush3.bf16.msra.mxu0 %v1477_v6  ;;  %1333 = vmatpush3.bf16.msra.mxu1 %v1477_v6 }
 0x1bf   : > { %1287 = vmatmul.mubr.bf16.vlgmr.msra.gmra.mxu0 %v665_v15  ;;  %1295 = vmatmul.mubr.bf16.vlgmr.msra.gmra.mxu1 %v669_v16 }
 0x1c0   : > { %1290 = vmatprep.mubr.bf16.mxu0 %v666_v17  ;;  %1298 = vmatprep.mubr.bf16.mxu1 %v670_v18 }
 0x1c7   : > { %1291 = vmatmul.mubr.bf16.gmra.mxu0 %v667_v23  ;;  %1299 = vmatmul.mubr.bf16.gmra.mxu1 %v671_v24 }
 0x27f   : > { %v1288_v26 = vpop.f32.mrf.mxu0  ;;  %v1296_v27 = vpop.f32.mrf.mxu1 }
 0x280   : > { %v786_v28 = vadd.f32 %v1288_v26, %v1095_v25  ;;  %v818_v29 = vadd.f32 %v1296_v27, %v1095_v25 }
 0x281   : > { %v777_v30 = vpop.f32.mrf.mxu0  ;;  %v809_v31 = vpop.f32.mrf.mxu1 }
 0x282   : > { %v778_v32 = vadd.f32 %v1095_v25, %v777_v30  ;;  %v810_v33 = vadd.f32 %v1095_v25, %v809_v31  ;;  %v842_v38 = vmax.f32 %v786_v28, 0.0  ;;  %v850_v39 = vmax.f32 %v818_v29, 0.0 }
 0x283   : > { %v1289_v34 = vpop.f32.mrf.mxu0  ;;  %v1297_v35 = vpop.f32.mrf.mxu1 }
 0x284   : > { %v789_v36 = vadd.f32 %v1289_v34, %v1095_v25  ;;  %v821_v37 = vadd.f32 %v1297_v35, %v1095_v25  ;;  %v840_v46 = vmax.f32 %v778_v32, 0.0  ;;  %v848_v47 = vmax.f32 %v810_v33, 0.0 }
 0x285   : > { %v780_v40 = vpop.f32.mrf.mxu0  ;;  %v812_v41 = vpop.f32.mrf.mxu1 }
 0x286   : > { %v843_v42 = vmax.f32 %v789_v36, 0.0  ;;  %v851_v43 = vmax.f32 %v821_v37, 0.0  ;;  %v781_v44 = vadd.f32 %v1095_v25, %v780_v40  ;;  %v813_v45 = vadd.f32 %v1095_v25, %v812_v41 }
 0x287   : > { %v1292_v48 = vpop.f32.mrf.mxu0  ;;  %v1300_v49 = vpop.f32.mrf.mxu1 }
 0x288   : > { %v1151_v50 = vpack.c.bf16 %v843_v42, %v842_v38  ;;  %v1171_v51 = vpack.c.bf16 %v851_v43, %v850_v39  ;;  %v841_v52 = vmax.f32 %v781_v44, 0.0  ;;  %v849_v53 = vmax.f32 %v813_v45, 0.0 }
 0x289   : > { %v802_v54 = vadd.f32 %v1292_v48, %v1095_v25  ;;  %v834_v55 = vadd.f32 %v1300_v49, %v1095_v25  ;;  %v793_v56 = vpop.f32.mrf.mxu0  ;;  %v825_v57 = vpop.f32.mrf.mxu1 }
 0x28a   : > { %1183 = vst [vmem:[%s1929_s16 + $0x8] sm:$0xff] %v1151_v50   ;;  %1187 = vst [vmem:[%s1929_s16 + $0x28] sm:$0xff] %v1171_v51   ;;  %v1146_v58 = vpack.c.bf16 %v841_v52, %v840_v46  ;;  %v1166_v59 = vpack.c.bf16 %v849_v53, %v848_v47  ;;  %v794_v60 = vadd.f32 %v1095_v25, %v793_v56 }
 0x28b   : > { %v826_v61 = vadd.f32 %v1095_v25, %v825_v57  ;;  %v1293_v62 = vpop.f32.mrf.mxu0  ;;  %v1301_v63 = vpop.f32.mrf.mxu1  ;;  %v846_v2 = vmax.f32 %v802_v54, 0.0  ;;  %v854_v3 = vmax.f32 %v834_v55, 0.0 }
 0x28c   : > { %1147 = vst [vmem:[%s1929_s16] sm:$0xff] %v1146_v58   ;;  %1186 = vst [vmem:[%s1929_s16 + $0x20] sm:$0xff] %v1166_v59   ;;  %v805_v0 = vadd.f32 %v1293_v62, %v1095_v25  ;;  %v837_v1 = vadd.f32 %v1301_v63, %v1095_v25  ;;  %v844_v10 = vmax.f32 %v794_v60, 0.0 }
 0x28d   : > { %v796_v4 = vpop.f32.mrf.mxu0  ;;  %v828_v5 = vpop.f32.mrf.mxu1  ;;  %v852_v11 = vmax.f32 %v826_v61, 0.0 }
 0x28e   : > { %v847_v6 = vmax.f32 %v805_v0, 0.0  ;;  %v855_v7 = vmax.f32 %v837_v1, 0.0  ;;  %v797_v8 = vadd.f32 %v1095_v25, %v796_v4  ;;  %v829_v9 = vadd.f32 %v1095_v25, %v828_v5 }
 0x290   : > { %v1161_v12 = vpack.c.bf16 %v847_v6, %v846_v2  ;;  %v1181_v13 = vpack.c.bf16 %v855_v7, %v854_v3  ;;  %v845_v14 = vmax.f32 %v797_v8, 0.0  ;;  %v853_v15 = vmax.f32 %v829_v9, 0.0 }
 0x292   : > { %1185 = vst [vmem:[%s1929_s16 + $0x18] sm:$0xff] %v1161_v12   ;;  %1189 = vst [vmem:[%s1929_s16 + $0x38] sm:$0xff] %v1181_v13   ;;  %v1156_v16 = vpack.c.bf16 %v845_v14, %v844_v10  ;;  %v1176_v17 = vpack.c.bf16 %v853_v15, %v852_v11 }
 0x294   : > { %1184 = vst [vmem:[%s1929_s16 + $0x10] sm:$0xff] %v1156_v16   ;;  %1188 = vst [vmem:[%s1929_s16 + $0x30] sm:$0xff] %v1176_v17  }
 0x295   : > { %1595 = shalt.err (!%p1592_p6)
}
 0x296   : > { %s1596_s7 = scalar_lea.hbm %s1978_s15, 1024  ;;  %s1600_s17 = scalar_lea.hbm %s2048_s6, 2048 }
 0x297   : > { %p1597_p0 = scmp.ne.s32.totalorder %s1978_s15, %s1596_s7  ;;  %p1601_p13 = scmp.lt.s32.totalorder %s1978_s15, %s2048_s6 }
 0x298   : > { %p1602_p7 = scmp.lt.s32.totalorder %s1600_s17, %s1596_s7 }
 0x299   : > { %p1598_p4 = pnand %p1597_p0, %p2080_p11 }
 0x29a   : > { %p1603_p8 = por %p1602_p7, %p1601_p13 }
 0x29b   : > { %p1599_p1 = pneg %p1598_p4 }
 0x29d   : > { %p1604_p9 = pnand %p1603_p8, %p1599_p1 }
 0x29f   : > { %1607 = shalt.err (!%p1604_p9)
}
 0x2a0   : > { %s1705_s22 = smov 64   ;;  %s1706_s25 = smov 4  }
 0x2a1   : > { %1346 = dma.vmem_to_hbm [thread:$0]  (%p2080_p11), %s1980_s26, 1024, %s1978_s15, %s1988_s11, %s1705_s22, %s1705_s22, %s1706_s25  }
 0x2a2 PF: > { %s2081_s14 = sld [smem:[#allocation21_spill]]  ;;  %s965_s28 = sand.u32 1, %s1660_s1  }
 0x2a3   : > { %s2082_s13 = sld [smem:[#allocation20_spill]]  ;;  %s966_s23 = scalar_lea.sflag [#allocation8], %s965_s28 }
 0x2a8   : > { %p2083_p3 = scmp.ne.s32.totalorder %s2081_s14, 0 }
 0x2a9   : > { %p2084_p5 = scmp.ge.s32.totalorder %s2082_s13, 2 }
 0x2ab   : > { %p1362_p12 = pnand %p2084_p5, %p2083_p3 }
 0x2ad   : > { %p1363_p10 = pneg %p1362_p12 }
 0x2af   : > { %1655 = dma.done.wait (%p1363_p10), %s966_s23, 1024  }
 0x2b0   : > { %1657 = vsyncadd (%p1363_p10), %s966_s23, 4294966272  ;;  %s33_s13 = sadd.s32 1, %s2082_s13   ;;  %s2085_s3 = sld [smem:[#allocation19_spill]] }
 0x2b1   : > { %p30_p2 = scmp.ge.s32.totalorder %s33_s13, 4   ;;  %s2086_s7 = sld [smem:[#allocation23_spill]] }
 0x2b2   : > { %s2087_s18 = sld [smem:[#allocation22_spill]]  ;;  %s2088_s1 = smov %s1664_s30 }
 0x2b3   : > { %s2090_s8 = smov %s1676_s9  ;;  %s2091_s9 = smov %s1680_s10 }
 0x2b4   : > { %s2092_s10 = smov %s1881_s29  ;;  %s2093_s11 = smov %s1688_s12 }
 0x2b5   :  { %32 = sbr.rel (!%p30_p2) target bundleno = 35 (0x23), region = 102 }
 0x2b6   : > { %s2089_s30 = smov %s2085_s3 }
 0x2b8   : > { %s2094_s12 = smov %s2087_s18 }
 0x2ba   :  { %971 = vsyncpa [#allocation7], 1 }
 0x2bb   :  { %973 = vsyncpa [#allocation7 + $0x1], 1 }
 0x2bc   :  { %974 = vsyncpa [#allocation10], 1 }
 0x2bd   :  { %975 = vsyncpa [#allocation8], 1 }
 0x2be   :  { %977 = vsyncpa [#allocation8 + $0x1], 1 }

</bundles_post_ra>
